<compile_context>
chip_gen: v6e
topology: v6e:2x2x1
jax: 0.10.0
libtpu: 0.0.40
codegen_flags: <defaults>
</compile_context>

<pallas_src>
import jax
import jax.numpy as jnp
from jax.experimental import pallas as pl
from jax.experimental.pallas import tpu as pltpu


# ----------------------------------------------------------------------------
# Pallas kernel
# Ref order: h_all (B, Hp), e (B, L, F), Vh3 (Hp, 3), Ve3 (F, 3), out (B, F)
# ----------------------------------------------------------------------------
def fusion_kernel(h_ref, e_ref, vh3_ref, ve3_ref, out_ref):
    e = e_ref[...]                                            # (B, L, F) f32
    B, L, F = e.shape

    # Encoder-side logits for all three heads: one MXU push.
    proj_e = jnp.dot(e.reshape(B * L, F), ve3_ref[...],
                     preferred_element_type=jnp.float32)      # (B*L, 3)
    proj_e = proj_e.reshape(B, L, 3)

    # Hidden-side logits for all three heads (fused bias folded into Vh3's ones row).
    h_logits = jnp.dot(h_ref[...], vh3_ref[...],
                       preferred_element_type=jnp.float32)    # (B, 3)

    # energies in [-1, 1] => exp cannot overflow; skip max subtraction.
    energies = jnp.tanh(proj_e + h_logits[:, None, :])        # (B, L, 3)
    p = jnp.exp(energies)                                     # (B, L, 3)

    denom = jnp.sum(p, axis=1)                                # (B, 3) softmax denominators
    inv = 1.0 / denom                                         # exact reciprocal, 6 elems
    # sum of the three per-head softmax weight maps -> (B, L)
    w_sum = jnp.sum(p * inv[:, None, :], axis=2)

    # out = mean_L( (w1+w2+w3)[:, :, None] * e / 3 )  -> (B, F)
    out = jnp.sum(w_sum[:, :, None] * e, axis=1) / (3.0 * L)
    out_ref[...] = out.astype(out_ref.dtype)


# ----------------------------------------------------------------------------
# One-time parameter preparation (run at model init, NOT per forward call).
# full_params: list of 3 tuples (w1, b1, w2, b2) with
#   w1: (H_i + F, M_i)  (= attn.weight^T), b1: (M_i,), w2: (M_i, 1), b2: (1,)
# Returns:
#   vh3: (Hp, 3)  block-stacked hidden-side vectors, fused-bias row, zero pad rows
#   ve3: (F, 3)   stacked encoder-side vectors
#   hp : padded hidden width Hp = H_total + 1 (+ pad to multiple of 8)
# ----------------------------------------------------------------------------
def prepare_fused_params(full_params, feature_size):
    F = feature_size
    vhs, ves, cs = [], [], []
    for (w1, b1, w2, b2) in full_params:
        H = w1.shape[0] - F
        w1f = w1.astype(jnp.float32)
        w2f = w2.astype(jnp.float32)
        v = (w1f @ w2f)[:, 0]                                  # (H + F,)
        vhs.append(v[:H])                                      # (H_i,)
        ves.append(v[H:])                                      # (F,)
        cs.append(b1.astype(jnp.float32) @ w2f[:, 0] + b2.astype(jnp.float32)[0])

    h_total = sum(int(vh.shape[0]) for vh in vhs)
    hp = h_total + 1
    hp += (-hp) % 8                                            # pad to sublane multiple

    cols = []
    off = 0
    for i, vh in enumerate(vhs):
        col = jnp.zeros((hp,), jnp.float32)
        col = col.at[off:off + vh.shape[0]].set(vh)
        col = col.at[h_total].set(cs[i])                       # fused bias on the ones row
        cols.append(col)
        off += int(vh.shape[0])
    vh3 = jnp.stack(cols, axis=1)                              # (Hp, 3)
    ve3 = jnp.stack(ves, axis=1).astype(jnp.float32)           # (F, 3)
    return vh3, ve3, hp


# ----------------------------------------------------------------------------
# Forward wrapper: only per-call work is packing the hiddens (they change per call).
# ----------------------------------------------------------------------------
def representation_fusion(qv, q1, q2, e, vh3, ve3, hp):
    B, L, F = e.shape
    h_total = qv.shape[-1] + q1.shape[-1] + q2.shape[-1]
    pad = hp - (h_total + 1)
    h_all = jnp.concatenate(
        [qv.astype(jnp.float32), q1.astype(jnp.float32), q2.astype(jnp.float32),
         jnp.ones((B, 1), jnp.float32),
         jnp.zeros((B, pad), jnp.float32)], axis=1)            # (B, Hp)

    flops = (2 * B * L * F * 3          # e @ Ve3
             + 2 * B * hp * 3           # h_all @ Vh3
             + 2 * B * L * F            # weighted mean over L
             + 10 * B * L * 3)          # softmax / elementwise misc
    transcendentals = 2 * 3 * B * L     # tanh + exp per head
    bytes_accessed = 4 * (B * L * F + B * hp + F * 3 + hp * 3 + B * F)

    vmem = pl.BlockSpec(memory_space=pltpu.MemorySpace.VMEM)

    return pl.pallas_call(
        fusion_kernel,
        out_shape=jax.ShapeDtypeStruct((B, F), jnp.float32),
        in_specs=[vmem] * 4,
        out_specs=vmem,
        cost_estimate=pl.CostEstimate(flops=flops,
                                      transcendentals=transcendentals,
                                      bytes_accessed=bytes_accessed),
    )(h_all, e, vh3, ve3)


# ----------------------------------------------------------------------------
# Pure-JAX reference (mirrors PyTorch semantics exactly: two Linears, tanh,
# softmax over L, mean over L of summed weights * e / 3)
# ----------------------------------------------------------------------------
def attention_weight_ref(hidden, enc, w1, b1, w2, b2):
    B, L, _ = enc.shape
    hh = jnp.broadcast_to(hidden[:, None, :], (B, L, hidden.shape[-1]))
    cat = jnp.concatenate([hh, enc], axis=2)
    x = cat @ w1 + b1
    energies = jnp.tanh(x @ w2 + b2)[..., 0]
    return jax.nn.softmax(energies, axis=1)


def fusion_ref(qv, q1, q2, e, full_params):
    ws = []
    for h, (w1, b1, w2, b2) in zip((qv, q1, q2), full_params):
        ws.append(attention_weight_ref(h, e, w1, b1, w2, b2))
    w_sum = ws[0] + ws[1] + ws[2]
    return jnp.mean(w_sum[:, :, None] * e / 3.0, axis=1)


# ----------------------------------------------------------------------------
# Deterministic parameter construction (shapes from Attention.__init__)
# ----------------------------------------------------------------------------
def make_attention_params(key, hidden_size, feature_size):
    in_dim = hidden_size + feature_size
    mid = in_dim // 2
    k1, k2, k3, k4 = jax.random.split(key, 4)
    w1 = jax.random.normal(k1, (in_dim, mid), jnp.float32) * 0.1   # attn.weight^T
    b1 = jax.random.normal(k2, (mid,), jnp.float32) * 0.1          # attn.bias
    w2 = jax.random.normal(k3, (mid, 1), jnp.float32) * 0.1        # linear_out.weight^T
    b2 = jax.random.normal(k4, (1,), jnp.float32) * 0.1            # linear_out.bias
    return w1, b1, w2, b2


if __name__ == "__main__":
    B, L = 2, 8
    F_QV, F_Q1, F_Q2 = 32, 16, 24   # qv_feature_size, query1_feature_size, query2_feature_size

    root = jax.random.PRNGKey(0)
    kqv, kq1, kq2, ke, kp0, kp1, kp2 = jax.random.split(root, 7)

    qv_feature = jax.random.normal(kqv, (B, F_QV), jnp.float32)
    query1_feature = jax.random.normal(kq1, (B, F_Q1), jnp.float32)
    query2_feature = jax.random.normal(kq2, (B, F_Q2), jnp.float32)
    qv_att_feature = jax.random.normal(ke, (B, L, F_QV), jnp.float32)

    # three Attention heads: (hidden_size, feature_size) = (F_QV,F_QV), (F_Q1,F_QV), (F_Q2,F_QV)
    full_params = [
        make_attention_params(kp0, F_QV, F_QV),
        make_attention_params(kp1, F_Q1, F_QV),
        make_attention_params(kp2, F_Q2, F_QV),
    ]

    # One-time (init-time) parameter collapse; reused across forward calls.
    vh3, ve3, hp = prepare_fused_params(full_params, F_QV)
    vh3, ve3 = jax.block_until_ready((vh3, ve3))

    out = representation_fusion(qv_feature, query1_feature, query2_feature,
                                qv_att_feature, vh3, ve3, hp)
    out = jax.block_until_ready(out)

    ref = fusion_ref(qv_feature, query1_feature, query2_feature,
                     qv_att_feature, full_params)
    assert out.shape == (B, F_QV)
    assert jnp.allclose(out, ref, rtol=1e-4, atol=1e-5), (out, ref)

    print("KERNEL_OK")
</pallas_src>

<mosaic_0001>
module attributes {stable_mosaic.version = 11 : i64} {
  func.func @fusion_kernel(%arg0: memref<2x80xf32, #tpu.memory_space<vmem>>, %arg1: memref<2x8x32xf32, #tpu.memory_space<vmem>>, %arg2: memref<80x3xf32, #tpu.memory_space<vmem>>, %arg3: memref<32x3xf32, #tpu.memory_space<vmem>>, %arg4: memref<2x32xf32, #tpu.memory_space<vmem>>) attributes {dimension_semantics = [], scalar_prefetch = 0 : i64, scratch_operands = 0 : i64, tpu.core_type = #tpu.core_type<tc>} {
    %c0 = arith.constant 0 : index
    %c0_0 = arith.constant 0 : index
    %c0_1 = arith.constant 0 : index
    %0 = vector.load %arg1[%c0, %c0_0, %c0_1] : memref<2x8x32xf32, #tpu.memory_space<vmem>>, vector<2x8x32xf32>
    %1 = vector.shape_cast %0 : vector<2x8x32xf32> to vector<16x32xf32>
    %c0_2 = arith.constant 0 : index
    %c0_3 = arith.constant 0 : index
    %2 = vector.load %arg3[%c0_2, %c0_3] : memref<32x3xf32, #tpu.memory_space<vmem>>, vector<32x3xf32>
    %cst = arith.constant dense<0.000000e+00> : vector<16x3xf32>
    %3 = tpu.matmul %1, %2, %cst {dimension_numbers = #tpu.dot_dimension_numbers<[1], [0], [0], [1], [0, 0, 1, 1], [], []>} : vector<16x32xf32>, vector<32x3xf32>, vector<16x3xf32> -> vector<16x3xf32>
    %4 = vector.shape_cast %3 : vector<16x3xf32> to vector<2x8x3xf32>
    %c0_4 = arith.constant 0 : index
    %c0_5 = arith.constant 0 : index
    %5 = vector.load %arg0[%c0_4, %c0_5] : memref<2x80xf32, #tpu.memory_space<vmem>>, vector<2x80xf32>
    %c0_6 = arith.constant 0 : index
    %c0_7 = arith.constant 0 : index
    %6 = vector.load %arg2[%c0_6, %c0_7] : memref<80x3xf32, #tpu.memory_space<vmem>>, vector<80x3xf32>
    %cst_8 = arith.constant dense<0.000000e+00> : vector<2x3xf32>
    %7 = tpu.matmul %5, %6, %cst_8 {dimension_numbers = #tpu.dot_dimension_numbers<[1], [0], [0], [1], [0, 0, 1, 1], [], []>} : vector<2x80xf32>, vector<80x3xf32>, vector<2x3xf32> -> vector<2x3xf32>
    %8 = vector.shape_cast %7 : vector<2x3xf32> to vector<2x1x3xf32>
    %9 = vector.broadcast %8 : vector<2x1x3xf32> to vector<2x8x3xf32>
    %10 = arith.addf %4, %9 : vector<2x8x3xf32>
    %11 = math.tanh %10 : vector<2x8x3xf32>
    %12 = math.exp %11 : vector<2x8x3xf32>
    %cst_9 = arith.constant dense<0.000000e+00> : vector<2x3xf32>
    %13 = vector.multi_reduction <add>, %12, %cst_9 [1] : vector<2x8x3xf32> to vector<2x3xf32>
    %cst_10 = arith.constant 1.000000e+00 : f32
    %14 = vector.broadcast %cst_10 : f32 to vector<2x3xf32>
    %15 = arith.divf %14, %13 : vector<2x3xf32>
    %16 = vector.shape_cast %15 : vector<2x3xf32> to vector<2x1x3xf32>
    %17 = vector.broadcast %16 : vector<2x1x3xf32> to vector<2x8x3xf32>
    %18 = arith.mulf %12, %17 : vector<2x8x3xf32>
    %cst_11 = arith.constant dense<0.000000e+00> : vector<2x8xf32>
    %19 = vector.multi_reduction <add>, %18, %cst_11 [2] : vector<2x8x3xf32> to vector<2x8xf32>
    %20 = vector.shape_cast %19 : vector<2x8xf32> to vector<2x8x1xf32>
    %21 = vector.broadcast %20 : vector<2x8x1xf32> to vector<2x8x32xf32>
    %22 = arith.mulf %21, %0 : vector<2x8x32xf32>
    %cst_12 = arith.constant dense<0.000000e+00> : vector<2x32xf32>
    %23 = vector.multi_reduction <add>, %22, %cst_12 [1] : vector<2x8x32xf32> to vector<2x32xf32>
    %cst_13 = arith.constant 2.400000e+01 : f32
    %24 = vector.broadcast %cst_13 : f32 to vector<2x32xf32>
    %25 = arith.divf %23, %24 : vector<2x32xf32>
    %c0_14 = arith.constant 0 : index
    %c0_15 = arith.constant 0 : index
    %26 = vector.load %arg4[%c0_14, %c0_15] : memref<2x32xf32, #tpu.memory_space<vmem>>, vector<2x32xf32>
    tpu.vector_store %arg4[%c0_14, %c0_15], %25 {strides = array<i32>} : memref<2x32xf32, #tpu.memory_space<vmem>>, vector<2x32xf32>,
    return
  }
}

</mosaic_0001>

<bundles_post_ra>
// kernel: tpu_custom_call.1
= control target key start
LH: loop header
LB: loop body
LE: loop exit
PB: predicated region body
PF: predicated region fallthrough
CT: control target
= control target key end

     0   :  { %v391_v1 = vmov 0.0   ;;  %vm392_vm0 = vmmov 0   ;;  %s490_s0 = inlined_call_operand.vmem [shape: f32[2,80], index: 0, kind: input, shape index: {}]   ;;  %s491_s1 = inlined_call_operand.vmem [shape: f32[2,8,32], index: 1, kind: input, shape index: {}]   ;;  %s492_s2 = inlined_call_operand.vmem [shape: f32[80,3], index: 2, kind: input, shape index: {}]   ;;  %s493_s3 = inlined_call_operand.vmem [shape: f32[32,3], index: 3, kind: input, shape index: {}]   ;;  %s494_s4 = inlined_call_operand.hbm [shape: f32[2,32], index: 4, kind: output, shape index: {}]  }
   0x1   :  { %v116_v0 = vld [vmem:[%s492_s2 + $0x48] sm:$0xff]  ;;  %330 = vmatprep.subr.mxu1 %v391_v1  ;;  %v115_v2 = vld [vmem:[%s492_s2 + $0x40] sm:$0xff]  ;;  %350 = vmatprep.mubr.msk.f32.mxu1 %vm392_vm0, %v391_v1  ;;  %v23_v3 = vld [vmem:[%s493_s3 + $0x18] sm:$0xff] }
   0x2   :  { %331 = vmatpush3.msra.mxu1 %v116_v0  ;;  %v114_v4 = vld [vmem:[%s492_s2 + $0x38] sm:$0xff]  ;;  %319 = vmatprep.subr.mxu0 %v23_v3  ;;  %v22_v5 = vld [vmem:[%s493_s3 + $0x10] sm:$0xff]  ;;  %v21_v6 = vld [vmem:[%s493_s3 + $0x8] sm:$0xff] }
   0x3   :  { %332 = vmatprep.subr.mxu1 %v391_v1  ;;  %320 = vmatpush3.msra.mxu0 %v23_v3  ;;  %v113_v7 = vld [vmem:[%s492_s2 + $0x30] sm:$0xff] }
   0x4   :  { %333 = vmatpush3.msra.mxu1 %v115_v2  ;;  %321 = vmatprep.subr.mxu0 %v22_v5 }
   0x5   :  { %334 = vmatprep.subr.mxu1 %v391_v1 }
   0x6   :  { %9 = vsyncpa [#allocation3], 0  ;;  %335 = vmatpush3.msra.mxu1 %v114_v4  ;;  %322 = vmatpush3.msra.mxu0 %v22_v5  ;;  %v20_v8 = vld [vmem:[%s493_s3] sm:$0xff]  ;;  %v112_v9 = vld [vmem:[%s492_s2 + $0x28] sm:$0xff]  ;;  %vm24_vm1 = vcmask 261120   ;;  %vm117_vm2 = vcmask 654336   ;;  %v195_v20 = vlaneseq }
   0x7   :  { %336 = vmatprep.subr.mxu1 %v391_v1  ;;  %323 = vmatprep.subr.mxu0 %v21_v6  ;;  %v450_v10 = vld [vmem:[%s491_s1] sm:$0xff]  ;;  %v458_v12 = vld [vmem:[%s491_s1 + $0x8] sm:$0xff]  ;;  %v110_v13 = vld [vmem:[%s492_s2 + $0x18] sm:$0xff]  ;;  %v393_v18 = vmov 1966171168   ;;  %vm232_vm3 = vcmask 23552  }
   0x8   :  { %337 = vmatpush3.msra.mxu1 %v113_v7  ;;  %324 = vmatpush3.msra.mxu0 %v21_v6  ;;  %v111_v11 = vld [vmem:[%s492_s2 + $0x20] sm:$0xff]  ;;  %v109_v14 = vld [vmem:[%s492_s2 + $0x10] sm:$0xff]  ;;  %v108_v15 = vld [vmem:[%s492_s2 + $0x8] sm:$0xff]  ;;  %v193_v19 = vunpack.c.l.s4 %v393_v18  ;;  %v196_v22 = vshrl.u32 %v195_v20, 7  ;;  %vm280_vm4 = vcmask 1041409   ;;  %vm283_vm5 = vcmask 254976  }
   0x9   :  { %338 = vmatprep.subr.mxu1 %v391_v1  ;;  %325 = vmatprep.subr.mxu0 %v20_v8  ;;  %v107_v16 = vld [vmem:[%s492_s2] sm:$0xff] }
   0xa   :  { %339 = vmatpush3.msra.mxu1 %v112_v9  ;;  %326 = vmatpush3.msra.mxu0 %v20_v8  ;;  %v106_v17 = vld [vmem:[%s490_s0] sm:$0x3]  ;;  %v194_v21 = vunpack.c.0.s8 %v193_v19  ;;  %v216_v26 = vsub.s32 0, %v196_v22  ;;  %s394_s0 = smov [#allocation2]  }
   0xb   :  { %340 = vmatprep.subr.mxu1 %v391_v1  ;;  %327 = vmatprep.mubr.msk.f32.mxu0 %vm24_vm1, %v450_v10  ;;  %s291_s2 = sshll.u32 %s394_s0, 4  ;;  %s292_s2 = int_to_ptr.vmem [resolvable:$true] %s291_s2 }
   0xc   :  { %341 = vmatpush3.msra.mxu1 %v111_v11  ;;  %328 = vmatmul.mubr.msk.f32.vlgmr.msra.gmra.mxu0 %vm24_vm1, %v458_v12  ;;  %v197_v23 = vsub.s32 %v194_v21, %v196_v22  ;;  %s369_s21 = scalar_lea.vmem %s292_s2, 32  ;;  %p374_p1 = scmp.lt.s32.totalorder %s292_s2, %s292_s2 }
   0xd   :  { %342 = vmatprep.subr.mxu1 %v391_v1  ;;  %p370_p0 = scmp.ne.s32.totalorder %s292_s2, %s369_s21  ;;  %p375_p2 = scmp.lt.s32.totalorder %s369_s21, %s369_s21 }
   0xe   :  { %343 = vmatpush3.msra.mxu1 %v110_v13 }
   0xf   :  { %344 = vmatprep.subr.mxu1 %v391_v1  ;;  %p376_p3 = por %p375_p2, %p374_p1 }
  0x10   :  { %345 = vmatpush3.msra.mxu1 %v109_v14 }
  0x11   :  { %346 = vmatprep.subr.mxu1 %v391_v1  ;;  %p377_p4 = pnand %p376_p3, %p370_p0 }
  0x12   :  { %347 = vmatpush3.msra.mxu1 %v108_v15 }
  0x13   :  { %348 = vmatprep.subr.mxu1 %v391_v1 }
  0x14   :  { %349 = vmatpush3.msra.mxu1 %v107_v16 }
  0x15   :  { %351 = vmatmul.mubr.msk.f32.vlgmr.msra.gmra.mxu1 %vm117_vm2, %v106_v17 }
  0xcc   :  { %v329_v27 = vpop.f32.mrf.mxu0 }
  0xce   :  { %v97_v33 = vpop.f32.mrf.mxu0 }
  0xd5   :  { %v187_v24 = vpop.f32.mrf.mxu1 }
  0xd6   :  { %v198_v25 = vrot.slane %v187_v24, %v197_v23 }
  0xd7   :  { %v352_v28 = vpop.f32.mrf.mxu1 }
  0xd8   :  { %v199_v29 = vcombine.high %v198_v25, %v198_v25  ;;  %v206_v30 = vrot.slane %v198_v25, %v197_v23 }
  0xda   :  { %v213_v31 = vrot.slane %v199_v29, %v197_v23  ;;  %v217_v32 = vrot.slane %v206_v30, %v216_v26 }
  0xdc   :  { %v221_v34 = vrot.slane %v213_v31, %v216_v26  ;;  %v224_v35 = vadd.f32 %v217_v32, %v97_v33 }
  0xde   :  { %v225_v36 = vadd.f32 %v329_v27, %v221_v34  ;;  %357 = vtanh.f32 %v224_v35 }
  0xe0   :  { %359 = vtanh.f32 %v225_v36 }
  0xeb   :  { %v358_v37 = vpop.eup %357 }
  0xec   :  { %v228_v38 = vmul.f32 1.442695, %v358_v37 }
  0xed   :  { %v360_v39 = vpop.eup %359 }
  0xee   :  { %v230_v40 = vmul.f32 1.442695, %v360_v39  ;;  %361 = vpow2.f32 %v228_v38 }
  0xf0   :  { %363 = vpow2.f32 %v230_v40 }
  0xfb   :  { %v362_v41 = vpop.eup %361 }
  0xfc   :  { %v233_v42 = vsel %vm232_vm3, %v362_v41, 0.0 }
  0xfd   :  { %v364_v43 = vpop.eup %363  ;;  %v234_v44 = vrot.slane %v233_v42, 4 }
  0xfe   :  { %v240_v45 = vsel %vm232_vm3, %v364_v43, 0.0 }
  0xff   :  { %v235_v46 = vadd.f32 %v234_v44, %v233_v42  ;;  %v241_v47 = vrot.slane %v240_v45, 4 }
 0x101   :  { %v236_v48 = vrot.slane %v235_v46, 2  ;;  %v242_v49 = vadd.f32 %v241_v47, %v240_v45 }
 0x103   :  { %v237_v50 = vadd.f32 %v236_v48, %v235_v46  ;;  %v243_v51 = vrot.slane %v242_v49, 2 }
 0x105   :  { %v238_v52 = vrot.slane %v237_v50, 1  ;;  %v244_v53 = vadd.f32 %v243_v51, %v242_v49 }
 0x107   :  { %v239_v54 = vadd.f32 %v238_v52, %v237_v50  ;;  %v245_v55 = vrot.slane %v244_v53, 1 }
 0x109   :  { %v246_v56 = vadd.f32 %v245_v55, %v244_v53  ;;  %365 = vrcp.f32 %v239_v54 }
 0x10b   :  { %367 = vrcp.f32 %v246_v56 }
 0x116   :  { %v366_v57 = vpop.eup %365 }
 0x117   :  { %v251_v58 = vmul.f32 %v366_v57, %v362_v41 }
 0x118   :  { %v368_v59 = vpop.eup %367 }
 0x119   :  { %v253_v60 = vsel %vm232_vm3, %v251_v58, 0.0  ;;  %v252_v61 = vmul.f32 %v368_v59, %v364_v43 }
 0x11a   :  { %254 = vadd.xlane.f32.xlu0 %v253_v60 }
 0x11b   :  { %v256_v62 = vsel %vm232_vm3, %v252_v61, 0.0 }
 0x11e   :  { %257 = vadd.xlane.f32.xlu0 %v256_v62 }
 0x1a3   :  { %v255_v63 = vpop.xlane.xlu0 %254 }
 0x1a4   :  { %v259_v0 = vmul.f32 %v255_v63, %v450_v10 }
 0x1a6   :  { %v261_v1 = vsel %vm24_vm1, %v259_v0, 0.0 }
 0x1a7   :  { %v262_v2 = vrot.slane %v261_v1, 4  ;;  %v258_v3 = vpop.xlane.xlu0 %257 }
 0x1a8   :  { %v260_v4 = vmul.f32 %v258_v3, %v458_v12 }
 0x1a9   :  { %v263_v5 = vadd.f32 %v262_v2, %v261_v1 }
 0x1aa   :  { %v268_v6 = vsel %vm24_vm1, %v260_v4, 0.0 }
 0x1ab   :  { %v264_v7 = vrot.slane %v263_v5, 2  ;;  %v269_v8 = vrot.slane %v268_v6, 4 }
 0x1ad   :  { %v265_v9 = vadd.f32 %v264_v7, %v263_v5  ;;  %v270_v11 = vadd.f32 %v269_v8, %v268_v6 }
 0x1af   :  { %v266_v13 = vrot.slane %v265_v9, 1  ;;  %v271_v14 = vrot.slane %v270_v11, 2 }
 0x1b1   :  { %v272_v15 = vadd.f32 %v271_v14, %v270_v11  ;;  %v267_v16 = vadd.f32 %v266_v13, %v265_v9 }
 0x1b3   :  { %v273_v17 = vrot.slane %v272_v15, 1  ;;  %v276_v10 = vmul.f32 0.041666668, %v267_v16 }
 0x1b5   :  { %v274_v18 = vadd.f32 %v273_v17, %v272_v15 }
 0x1b7   :  { %v277_v19 = vmul.f32 0.041666668, %v274_v18 }
 0x1b9   :  { %v281_v12 = vsel %vm280_vm4, %v277_v19, %v276_v10 }
 0x1ba   :  { %284 = vst.msk [vmem:[#allocation2] sm:$0x3] %vm283_vm5, %v281_v12 }
 0x1bb   :  { %380 = shalt.err (!%p377_p4)
}
 0x1bc   :  { %294 = dma.vmem_to_hbm [thread:$0]  %s292_s2, 32, %s494_s4, [#allocation3]  }
 0x1bd   :  { %389 = dma.done.wait [#allocation3], 32  }
 0x1be   :  { %390 = vsyncadd [#allocation3], 4294967264 }
 0x1bf   :  { %298 = vsyncpa [#allocation3], 1 }

</bundles_post_ra>
